<compile_context>
chip_gen: v7x
topology: tpu7x:2x2x1
jax: 0.10.0
libtpu: 0.0.40
codegen_flags: <defaults>
</compile_context>

<pallas_src>
import functools

import jax
import jax.numpy as jnp
from jax.experimental import pallas as pl
from jax.experimental.pallas import tpu as pltpu


def _residual_block_kernel(x_ref, w1_ref, w2_ref, b1_ref, b2_ref, mask_ref,
                           o_ref, *, wp):
    """Fused ResidualBlock on a lane-dense (C, Mp) activation slab.

    x_ref   : (Cp, Mp)   zero-padded flat image, pixels on lanes
    w1_ref  : (Cp, 9*Cp) conv1 weights, BN1 scale folded in, tap-major (kh,kw,ci)
    w2_ref  : (Cp, 9*Cp) conv2 weights, BN2 scale folded in, tap-major
    b1_ref, b2_ref : (Cp, 1) folded BN biases
    mask_ref: (1, Mp)    1.0 at real (interior) pixels, 0.0 at halo / tail
    o_ref   : (Cp, Mp)   output slab (interior extracted in the wrapper)
    """
    mp = x_ref.shape[1]

    def conv3x3(act, w_mat):
        # im2col: the 9 taps are uniform lane shifts of the padded flat image.
        taps = []
        for kh in range(3):
            for kw in range(3):
                delta = (kh - 1) * wp + (kw - 1)
                if delta == 0:
                    taps.append(act)
                else:
                    taps.append(pltpu.roll(act, shift=(-delta) % mp, axis=1))
        patches = jnp.concatenate(taps, axis=0)            # (9*Cp, Mp)
        # Single MXU matmul per conv, K = 9*Cp, lane-dense M on the output.
        return jnp.dot(w_mat, patches, preferred_element_type=jnp.float32)

    x = x_ref[...]
    mask = mask_ref[...]

    # conv1 (BN1 scale folded into weights) + bias + ReLU; re-zero the halo so
    # conv2 sees true zero padding.
    y1 = jnp.maximum(conv3x3(x, w1_ref[...]) + b1_ref[...], 0.0) * mask
    # conv2 (BN2 scale folded) + bias + identity residual + ReLU.
    y2 = conv3x3(y1, w2_ref[...]) + b2_ref[...] + x
    o_ref[...] = jnp.maximum(y2, 0.0).astype(o_ref.dtype)


def residual_block_forward(x_nchw, params, eps=1e-5):
    """params = (w1, g1, be1, m1, v1, w2, g2, be2, m2, v2); conv weights OIHW."""
    w1, g1, be1, m1, v1, w2, g2, be2, m2, v2 = params

    N, Cin, H, W = x_nchw.shape
    Cout = w1.shape[0]
    assert Cin == Cout, "downsample=None requires in_channels == out_channels"

    Hp, Wp = H + 2, W + 2
    Cp = ((max(Cin, Cout) + 7) // 8) * 8          # pad channels to sublane tile
    M = N * Hp * Wp                               # flattened padded pixels
    Mp = ((M + 127) // 128) * 128                 # pad pixel axis to lane tile

    # ---- activations: channels on sublanes, padded flat pixels on lanes ----
    x_c = jnp.transpose(x_nchw, (1, 0, 2, 3)).astype(jnp.float32)   # (Cin,N,H,W)
    x_p = jnp.pad(x_c, ((0, Cp - Cin), (0, 0), (1, 1), (1, 1)))     # (Cp,N,Hp,Wp)
    x2d = jnp.pad(x_p.reshape(Cp, M), ((0, 0), (0, Mp - M)))        # (Cp, Mp)

    # ---- fold eval-mode BN into conv weights (scale) + per-channel bias ----
    inv1 = (g1 / jnp.sqrt(v1 + eps)).astype(jnp.float32)
    inv2 = (g2 / jnp.sqrt(v2 + eps)).astype(jnp.float32)

    w1f = jnp.zeros((Cp, Cp, 3, 3), jnp.float32)
    w1f = w1f.at[:Cout, :Cin].set(w1.astype(jnp.float32)
                                  * inv1[:, None, None, None])
    w2f = jnp.zeros((Cp, Cp, 3, 3), jnp.float32)
    w2f = w2f.at[:Cout, :Cout].set(w2.astype(jnp.float32)
                                   * inv2[:, None, None, None])
    # OIHW -> (O, KH, KW, I) -> (O, 9*I): tap-major, matching kernel im2col.
    w1m = jnp.transpose(w1f, (0, 2, 3, 1)).reshape(Cp, 9 * Cp)
    w2m = jnp.transpose(w2f, (0, 2, 3, 1)).reshape(Cp, 9 * Cp)

    b1 = jnp.zeros((Cp, 1), jnp.float32).at[:Cout, 0].set(
        (be1 - m1 * inv1).astype(jnp.float32))
    b2 = jnp.zeros((Cp, 1), jnp.float32).at[:Cout, 0].set(
        (be2 - m2 * inv2).astype(jnp.float32))

    # ---- interior mask: 1 at real pixels, 0 at halo / tail positions ----
    hh = jnp.arange(Hp)[:, None]
    ww = jnp.arange(Wp)[None, :]
    m_img = ((hh >= 1) & (hh <= H) & (ww >= 1) & (ww <= W)).astype(jnp.float32)
    mask = jnp.pad(jnp.broadcast_to(m_img[None], (N, Hp, Wp)).reshape(1, M),
                   ((0, 0), (0, Mp - M)))                           # (1, Mp)

    kernel = functools.partial(_residual_block_kernel, wp=Wp)

    out2d = pl.pallas_call(
        kernel,
        out_shape=jax.ShapeDtypeStruct((Cp, Mp), jnp.float32),
        grid=(1,),                                  # whole batch in one step
        in_specs=[
            pl.BlockSpec((Cp, Mp), lambda i: (0, 0)),
            pl.BlockSpec((Cp, 9 * Cp), lambda i: (0, 0)),
            pl.BlockSpec((Cp, 9 * Cp), lambda i: (0, 0)),
            pl.BlockSpec((Cp, 1), lambda i: (0, 0)),
            pl.BlockSpec((Cp, 1), lambda i: (0, 0)),
            pl.BlockSpec((1, Mp), lambda i: (0, 0)),
        ],
        out_specs=pl.BlockSpec((Cp, Mp), lambda i: (0, 0)),
        compiler_params=pltpu.CompilerParams(
            dimension_semantics=("arbitrary",)),
    )(x2d, w1m, w2m, b1, b2, mask)

    # Drop channel / pixel padding and the 1-pixel halo; back to NCHW.
    out = out2d[:Cout, :M].reshape(Cout, N, Hp, Wp)[:, :, 1:H + 1, 1:W + 1]
    return jnp.transpose(out, (1, 0, 2, 3)).astype(x_nchw.dtype)


def _reference(x_nchw, params, eps=1e-5):
    """Pure-JAX reference matching the PyTorch forward (eval-mode BN)."""
    w1, g1, be1, m1, v1, w2, g2, be2, m2, v2 = params

    def conv(x, w):
        return jax.lax.conv_general_dilated(
            x, w, window_strides=(1, 1), padding=((1, 1), (1, 1)),
            dimension_numbers=('NCHW', 'OIHW', 'NCHW'))

    def bn(x, g, b, m, v):
        c = lambda a: a[None, :, None, None]
        return (x - c(m)) / jnp.sqrt(c(v) + eps) * c(g) + c(b)

    out = jax.nn.relu(bn(conv(x_nchw, w1), g1, be1, m1, v1))
    out = bn(conv(out, w2), g2, be2, m2, v2)
    return jax.nn.relu(out + x_nchw)


if __name__ == "__main__":
    N, C, H, W = 2, 4, 16, 16                    # in_channels = out_channels = 4
    key = jax.random.PRNGKey(0)
    keys = jax.random.split(key, 11)

    x = jax.random.normal(keys[0], (N, C, H, W), jnp.float32)

    # conv weights (OIHW, PyTorch layout), bias=False
    w1 = 0.1 * jax.random.normal(keys[1], (C, C, 3, 3), jnp.float32)
    w2 = 0.1 * jax.random.normal(keys[2], (C, C, 3, 3), jnp.float32)
    # BatchNorm parameters / running stats (deterministic, non-trivial)
    g1 = 1.0 + 0.1 * jax.random.normal(keys[3], (C,), jnp.float32)
    be1 = 0.1 * jax.random.normal(keys[4], (C,), jnp.float32)
    m1 = 0.1 * jax.random.normal(keys[5], (C,), jnp.float32)
    v1 = 0.5 + jax.random.uniform(keys[6], (C,), jnp.float32)
    g2 = 1.0 + 0.1 * jax.random.normal(keys[7], (C,), jnp.float32)
    be2 = 0.1 * jax.random.normal(keys[8], (C,), jnp.float32)
    m2 = 0.1 * jax.random.normal(keys[9], (C,), jnp.float32)
    v2 = 0.5 + jax.random.uniform(keys[10], (C,), jnp.float32)

    params = (w1, g1, be1, m1, v1, w2, g2, be2, m2, v2)

    out = residual_block_forward(x, params)
    out = jax.block_until_ready(out)

    ref = _reference(x, params)
    assert out.shape == (N, C, H, W) and out.dtype == jnp.float32
    assert jnp.allclose(out, ref, atol=1e-4, rtol=1e-4), \
        f"max abs err = {jnp.max(jnp.abs(out - ref))}"

    print("KERNEL_OK")
</pallas_src>

<mosaic_0001>
module attributes {stable_mosaic.version = 11 : i64} {
  func.func @_residual_block_kernel(%arg0: i32, %arg1: memref<8x768xf32, #tpu.memory_space<vmem>>, %arg2: memref<8x72xf32, #tpu.memory_space<vmem>>, %arg3: memref<8x72xf32, #tpu.memory_space<vmem>>, %arg4: memref<8x1xf32, #tpu.memory_space<vmem>>, %arg5: memref<8x1xf32, #tpu.memory_space<vmem>>, %arg6: memref<1x768xf32, #tpu.memory_space<vmem>>, %arg7: memref<8x768xf32, #tpu.memory_space<vmem>>) attributes {dimension_semantics = [#tpu.dimension_semantics<arbitrary>], iteration_bounds = array<i64: 1>, scalar_prefetch = 0 : i64, scratch_operands = 0 : i64, tpu.core_type = #tpu.core_type<tc>, window_params = [{pipeline_mode = #tpu.pipeline_mode<synchronous>, transform_indices = @transform_0, window_bounds = array<i64: 8, 768>}, {pipeline_mode = #tpu.pipeline_mode<synchronous>, transform_indices = @transform_1, window_bounds = array<i64: 8, 72>}, {pipeline_mode = #tpu.pipeline_mode<synchronous>, transform_indices = @transform_2, window_bounds = array<i64: 8, 72>}, {pipeline_mode = #tpu.pipeline_mode<synchronous>, transform_indices = @transform_3, window_bounds = array<i64: 8, 1>}, {pipeline_mode = #tpu.pipeline_mode<synchronous>, transform_indices = @transform_4, window_bounds = array<i64: 8, 1>}, {pipeline_mode = #tpu.pipeline_mode<synchronous>, transform_indices = @transform_5, window_bounds = array<i64: 1, 768>}, {pipeline_mode = #tpu.pipeline_mode<synchronous>, transform_indices = @transform_6, window_bounds = array<i64: 8, 768>}]} {
    %c0 = arith.constant 0 : index
    %c0_0 = arith.constant 0 : index
    %0 = vector.load %arg1[%c0, %c0_0] : memref<8x768xf32, #tpu.memory_space<vmem>>, vector<8x768xf32>
    %c0_1 = arith.constant 0 : index
    %c0_2 = arith.constant 0 : index
    %1 = vector.load %arg6[%c0_1, %c0_2] : memref<1x768xf32, #tpu.memory_space<vmem>>, vector<1x768xf32>
    %c0_3 = arith.constant 0 : index
    %c0_4 = arith.constant 0 : index
    %2 = vector.load %arg2[%c0_3, %c0_4] : memref<8x72xf32, #tpu.memory_space<vmem>>, vector<8x72xf32>
    %c19_i32 = arith.constant 19 : i32
    %3 = tpu.dynamic_rotate %0 by %c19_i32 dim 1 : vector<8x768xf32>, i32 -> vector<8x768xf32>
    %c18_i32 = arith.constant 18 : i32
    %4 = tpu.dynamic_rotate %0 by %c18_i32 dim 1 : vector<8x768xf32>, i32 -> vector<8x768xf32>
    %c17_i32 = arith.constant 17 : i32
    %5 = tpu.dynamic_rotate %0 by %c17_i32 dim 1 : vector<8x768xf32>, i32 -> vector<8x768xf32>
    %c1_i32 = arith.constant 1 : i32
    %6 = tpu.dynamic_rotate %0 by %c1_i32 dim 1 : vector<8x768xf32>, i32 -> vector<8x768xf32>
    %c767_i32 = arith.constant 767 : i32
    %7 = tpu.dynamic_rotate %0 by %c767_i32 dim 1 : vector<8x768xf32>, i32 -> vector<8x768xf32>
    %c751_i32 = arith.constant 751 : i32
    %8 = tpu.dynamic_rotate %0 by %c751_i32 dim 1 : vector<8x768xf32>, i32 -> vector<8x768xf32>
    %c750_i32 = arith.constant 750 : i32
    %9 = tpu.dynamic_rotate %0 by %c750_i32 dim 1 : vector<8x768xf32>, i32 -> vector<8x768xf32>
    %c749_i32 = arith.constant 749 : i32
    %10 = tpu.dynamic_rotate %0 by %c749_i32 dim 1 : vector<8x768xf32>, i32 -> vector<8x768xf32>
    %11 = tpu.concatenate %3, %4, %5, %6, %0, %7, %8, %9, %10 in 0 : vector<8x768xf32>, vector<8x768xf32>, vector<8x768xf32>, vector<8x768xf32>, vector<8x768xf32>, vector<8x768xf32>, vector<8x768xf32>, vector<8x768xf32>, vector<8x768xf32> -> vector<72x768xf32>
    %cst = arith.constant dense<0.000000e+00> : vector<8x768xf32>
    %12 = tpu.matmul %2, %11, %cst {dimension_numbers = #tpu.dot_dimension_numbers<[1], [0], [0], [1], [0, 0, 1, 1], [], []>} : vector<8x72xf32>, vector<72x768xf32>, vector<8x768xf32> -> vector<8x768xf32>
    %c0_5 = arith.constant 0 : index
    %c0_6 = arith.constant 0 : index
    %13 = vector.load %arg4[%c0_5, %c0_6] : memref<8x1xf32, #tpu.memory_space<vmem>>, vector<8x1xf32>
    %14 = vector.broadcast %13 : vector<8x1xf32> to vector<8x768xf32>
    %15 = arith.addf %12, %14 : vector<8x768xf32>
    %cst_7 = arith.constant 0.000000e+00 : f32
    %16 = vector.broadcast %cst_7 : f32 to vector<8x768xf32>
    %17 = arith.maximumf %15, %16 : vector<8x768xf32>
    %18 = vector.broadcast %1 : vector<1x768xf32> to vector<8x768xf32>
    %19 = arith.mulf %17, %18 : vector<8x768xf32>
    %c0_8 = arith.constant 0 : index
    %c0_9 = arith.constant 0 : index
    %20 = vector.load %arg3[%c0_8, %c0_9] : memref<8x72xf32, #tpu.memory_space<vmem>>, vector<8x72xf32>
    %c19_i32_10 = arith.constant 19 : i32
    %21 = tpu.dynamic_rotate %19 by %c19_i32_10 dim 1 : vector<8x768xf32>, i32 -> vector<8x768xf32>
    %c18_i32_11 = arith.constant 18 : i32
    %22 = tpu.dynamic_rotate %19 by %c18_i32_11 dim 1 : vector<8x768xf32>, i32 -> vector<8x768xf32>
    %c17_i32_12 = arith.constant 17 : i32
    %23 = tpu.dynamic_rotate %19 by %c17_i32_12 dim 1 : vector<8x768xf32>, i32 -> vector<8x768xf32>
    %c1_i32_13 = arith.constant 1 : i32
    %24 = tpu.dynamic_rotate %19 by %c1_i32_13 dim 1 : vector<8x768xf32>, i32 -> vector<8x768xf32>
    %c767_i32_14 = arith.constant 767 : i32
    %25 = tpu.dynamic_rotate %19 by %c767_i32_14 dim 1 : vector<8x768xf32>, i32 -> vector<8x768xf32>
    %c751_i32_15 = arith.constant 751 : i32
    %26 = tpu.dynamic_rotate %19 by %c751_i32_15 dim 1 : vector<8x768xf32>, i32 -> vector<8x768xf32>
    %c750_i32_16 = arith.constant 750 : i32
    %27 = tpu.dynamic_rotate %19 by %c750_i32_16 dim 1 : vector<8x768xf32>, i32 -> vector<8x768xf32>
    %c749_i32_17 = arith.constant 749 : i32
    %28 = tpu.dynamic_rotate %19 by %c749_i32_17 dim 1 : vector<8x768xf32>, i32 -> vector<8x768xf32>
    %29 = tpu.concatenate %21, %22, %23, %24, %19, %25, %26, %27, %28 in 0 : vector<8x768xf32>, vector<8x768xf32>, vector<8x768xf32>, vector<8x768xf32>, vector<8x768xf32>, vector<8x768xf32>, vector<8x768xf32>, vector<8x768xf32>, vector<8x768xf32> -> vector<72x768xf32>
    %cst_18 = arith.constant dense<0.000000e+00> : vector<8x768xf32>
    %30 = tpu.matmul %20, %29, %cst_18 {dimension_numbers = #tpu.dot_dimension_numbers<[1], [0], [0], [1], [0, 0, 1, 1], [], []>} : vector<8x72xf32>, vector<72x768xf32>, vector<8x768xf32> -> vector<8x768xf32>
    %c0_19 = arith.constant 0 : index
    %c0_20 = arith.constant 0 : index
    %31 = vector.load %arg5[%c0_19, %c0_20] : memref<8x1xf32, #tpu.memory_space<vmem>>, vector<8x1xf32>
    %32 = vector.broadcast %31 : vector<8x1xf32> to vector<8x768xf32>
    %33 = arith.addf %30, %32 : vector<8x768xf32>
    %34 = arith.addf %33, %0 : vector<8x768xf32>
    %cst_21 = arith.constant 0.000000e+00 : f32
    %35 = vector.broadcast %cst_21 : f32 to vector<8x768xf32>
    %36 = arith.maximumf %34, %35 : vector<8x768xf32>
    %c0_22 = arith.constant 0 : index
    %c0_23 = arith.constant 0 : index
    %37 = vector.load %arg7[%c0_22, %c0_23] : memref<8x768xf32, #tpu.memory_space<vmem>>, vector<8x768xf32>
    tpu.vector_store %arg7[%c0_22, %c0_23], %36 {strides = array<i32>} : memref<8x768xf32, #tpu.memory_space<vmem>>, vector<8x768xf32>,
    return
  }
  func.func @transform_0(%arg0: i32) -> (i32, i32) {
    %c0_i32 = arith.constant 0 : i32
    %c0_i32_0 = arith.constant 0 : i32
    %c0_i32_1 = arith.constant 0 : i32
    return %c0_i32, %c0_i32_0 : i32, i32
  }
  func.func @transform_1(%arg0: i32) -> (i32, i32) {
    %c0_i32 = arith.constant 0 : i32
    %c0_i32_0 = arith.constant 0 : i32
    %c0_i32_1 = arith.constant 0 : i32
    return %c0_i32, %c0_i32_0 : i32, i32
  }
  func.func @transform_2(%arg0: i32) -> (i32, i32) {
    %c0_i32 = arith.constant 0 : i32
    %c0_i32_0 = arith.constant 0 : i32
    %c0_i32_1 = arith.constant 0 : i32
    return %c0_i32, %c0_i32_0 : i32, i32
  }
  func.func @transform_3(%arg0: i32) -> (i32, i32) {
    %c0_i32 = arith.constant 0 : i32
    %c0_i32_0 = arith.constant 0 : i32
    %c0_i32_1 = arith.constant 0 : i32
    return %c0_i32, %c0_i32_0 : i32, i32
  }
  func.func @transform_4(%arg0: i32) -> (i32, i32) {
    %c0_i32 = arith.constant 0 : i32
    %c0_i32_0 = arith.constant 0 : i32
    %c0_i32_1 = arith.constant 0 : i32
    return %c0_i32, %c0_i32_0 : i32, i32
  }
  func.func @transform_5(%arg0: i32) -> (i32, i32) {
    %c0_i32 = arith.constant 0 : i32
    %c0_i32_0 = arith.constant 0 : i32
    %c0_i32_1 = arith.constant 0 : i32
    return %c0_i32, %c0_i32_0 : i32, i32
  }
  func.func @transform_6(%arg0: i32) -> (i32, i32) {
    %c0_i32 = arith.constant 0 : i32
    %c0_i32_0 = arith.constant 0 : i32
    %c0_i32_1 = arith.constant 0 : i32
    return %c0_i32, %c0_i32_0 : i32, i32
  }
}

</mosaic_0001>

<bundles_post_ra>
// kernel: tpu_custom_call.1
= control target key start
LH: loop header
LB: loop body
LE: loop exit
PB: predicated region body
PF: predicated region fallthrough
CT: control target
= control target key end

     0   :  { %11 = vsyncpa [#allocation3], 0  ;;  %s1870_s0 = inlined_call_operand.hbm [shape: f32[8,768], index: 0, kind: input, shape index: {}]   ;;  %s1871_s1 = inlined_call_operand.vmem [shape: f32[8,72], index: 1, kind: input, shape index: {}]   ;;  %s1872_s2 = inlined_call_operand.vmem [shape: f32[8,72], index: 2, kind: input, shape index: {}]   ;;  %s1873_s3 = inlined_call_operand.vmem [shape: f32[8,1], index: 3, kind: input, shape index: {}]   ;;  %s1874_s4 = inlined_call_operand.vmem [shape: f32[8,1], index: 4, kind: input, shape index: {}]   ;;  %s1875_s5 = inlined_call_operand.vmem [shape: f32[1,768], index: 5, kind: input, shape index: {}]   ;;  %s1876_s6 = inlined_call_operand.hbm [shape: f32[8,768], index: 6, kind: output, shape index: {}]  }
   0x1   :  { %12 = vsyncpa [#allocation4], 0  ;;  %s1208_s21 = smov [#allocation2]   ;;  %s1160_s25 = scalar_lea.hbm %s1870_s0, 768 }
   0x2   :  { %s19_s22 = sshll.u32 %s1208_s21, 4  ;;  %p1161_p0 = scmp.ne.s32.totalorder %s1870_s0, %s1160_s25  ;;  %s20_s22 = int_to_ptr.vmem [resolvable:$true] %s19_s22 }
   0x3   :  { %p1164_p1 = scmp.lt.u32.totalorder %s1160_s25, %s1870_s0 }
   0x5   :  { %p1166_p2 = pnand %p1164_p1, %p1161_p0 }
   0x7   :  { %1169 = shalt.err (!%p1166_p2)
}
   0x8   :  { %s1170_s30 = scalar_lea.vmem %s20_s22, 768  ;;  %p1175_p4 = scmp.lt.s32.totalorder %s20_s22, %s20_s22 }
   0x9   :  { %p1171_p3 = scmp.ne.s32.totalorder %s20_s22, %s1170_s30  ;;  %p1176_p5 = scmp.lt.s32.totalorder %s1170_s30, %s1170_s30 }
   0xb   :  { %p1177_p6 = por %p1176_p5, %p1175_p4 }
   0xd   :  { %p1178_p7 = pnand %p1177_p6, %p1171_p3 }
   0xf   :  { %1181 = shalt.err (!%p1178_p7)
}
  0x10   :  { %22 = dma.hbm_to_vmem [thread:$0]  %s1870_s0, 768, %s20_s22, [#allocation3]  }
  0x11   :  { %1204 = dma.done.wait [#allocation3], 768  }
  0x12   :  { %1205 = vsyncadd [#allocation3], 4294966528  ;;  %v1267_v0 = vld [vmem:[#allocation2 + $0x20] sm:$0xff]  ;;  %v1269_v1 = vld [vmem:[#allocation2 + $0x28] sm:$0xff]  ;;  %s1209_s9 = smov 19   ;;  %s1210_s0 = smov 18   ;;  %v56_v13 = vlaneseq }
  0x13   :  { %v1271_v2 = vld [vmem:[#allocation2] sm:$0xff]  ;;  %v988_v3 = vpack.i.bf16 %v1267_v0, %v1269_v1  ;;  %v1275_v4 = vld [vmem:[#allocation2 + $0x8] sm:$0xff]  ;;  %s1211_s10 = smov 1   ;;  %s1212_s11 = smov 17   ;;  %v1285_v6 = vld [vmem:[#allocation2 + $0x10] sm:$0xff]  ;;  %v1216_v9 = vmov 0.0  }
  0x14   :  { %v978_v5 = vpack.i.bf16 %v1275_v4, %v1271_v2  ;;  %v1018_v7 = vpack.i.bf16 %v1285_v6, %v1275_v4  ;;  %s1213_s12 = smov 127   ;;  %s1214_s13 = smov 110   ;;  %v1300_v8 = vld [vmem:[#allocation2 + $0x18] sm:$0xff]  ;;  %272 = vmatprep.mubr.f32.mxu0 %v1216_v9  ;;  %343 = vmatprep.mubr.f32.mxu1 %v1216_v9  ;;  %v1218_v11 = vmov 0   ;;  %v198_v12 = vld [vmem:[%s1873_s3] sm:$0xff]  ;;  %v1339_v16 = vand.u32 127, %v56_v13 }
  0x15   :  { %989 = vrot.lane.b32.xlu1 %v988_v3, %s1209_s9  ;;  %s1215_s14 = smov 111   ;;  %s1217_s15 = smov 109   ;;  %v1038_v10 = vpack.i.bf16 %v1285_v6, %v1300_v8  ;;  %1068 = vset.pattern.permute.xlu0 %v1218_v11  ;;  %vm204_vm8 = vcmask 588800  }
  0x16   :  { %979 = vrot.lane.b32.xlu0 %v978_v5, %s1209_s9  ;;  %1154 = vset.pattern.permute.xlu1 %v1218_v11  ;;  %vm58_vm0 = vcmp.lt.s32.totalorder %v1339_v16, 19  ;;  %vm77_vm1 = vcmp.lt.s32.totalorder %v1339_v16, 18  ;;  %vm96_vm2 = vcmp.lt.s32.totalorder %v1339_v16, 17  ;;  %vm115_vm3 = vcmp.lt.s32.totalorder %v1339_v16, 1 }
  0x17   :  { %vm134_vm4 = vcmp.lt.s32.totalorder %v1339_v16, 127  ;;  %vm172_vm5 = vcmp.lt.s32.totalorder %v1339_v16, 110  ;;  %vm153_vm6 = vcmp.lt.s32.totalorder %v1339_v16, 111  ;;  %vm191_vm7 = vcmp.lt.s32.totalorder %v1339_v16, 109 }
  0x19   :  { %994 = vrot.lane.b32.xlu1 %v988_v3, %s1210_s0 }
  0x1a   :  { %984 = vrot.lane.b32.xlu0 %v978_v5, %s1210_s0 }
  0x1d   :  { %1004 = vrot.lane.b32.xlu1 %v978_v5, %s1211_s10 }
  0x1e   :  { %999 = vrot.lane.b32.xlu0 %v978_v5, %s1212_s11 }
  0x21   :  { %1014 = vrot.lane.b32.xlu1 %v988_v3, %s1211_s10 }
  0x22   :  { %1009 = vrot.lane.b32.xlu0 %v988_v3, %s1212_s11 }
  0x25   :  { %122 = vrot.lane.b32.xlu1 %v1271_v2, %s1213_s12 }
  0x26   :  { %1019 = vrot.lane.b32.xlu0 %v1018_v7, %s1213_s12 }
  0x29   :  { %1029 = vrot.lane.b32.xlu1 %v1018_v7, %s1214_s13 }
  0x2a   :  { %1024 = vrot.lane.b32.xlu0 %v1018_v7, %s1215_s14 }
  0x2d   :  { %160 = vrot.lane.b32.xlu1 %v1271_v2, %s1214_s13 }
  0x2e   :  { %141 = vrot.lane.b32.xlu0 %v1271_v2, %s1215_s14 }
  0x31   :  { %183 = vrot.lane.b32.xlu1 %v1285_v6, %s1217_s15 }
  0x32   :  { %181 = vrot.lane.b32.xlu0 %v1275_v4, %s1217_s15 }
  0x35   :  { %1039 = vrot.lane.b32.xlu1 %v1038_v10, %s1210_s0 }
  0x36   :  { %1034 = vrot.lane.b32.xlu0 %v1038_v10, %s1209_s9 }
  0x39   :  { %1044 = vrot.lane.b32.xlu1 %v1038_v10, %s1212_s11 }
  0x3a   :  { %179 = vrot.lane.b32.xlu0 %v1271_v2, %s1217_s15 }
  0x3d   :  { %1054 = vrot.lane.b32.xlu1 %v988_v3, %s1213_s12 }
  0x3e   :  { %1049 = vrot.lane.b32.xlu0 %v1038_v10, %s1211_s10 }
  0x41   :  { %1064 = vrot.lane.b32.xlu1 %v988_v3, %s1214_s13 }
  0x42   :  { %1059 = vrot.lane.b32.xlu0 %v988_v3, %s1215_s14 }
  0x45   :  { %189 = vrot.lane.b32.xlu1 %v1269_v1, %s1217_s15 }
  0x46   :  { %128 = vrot.lane.b32.xlu0 %v1300_v8, %s1213_s12 }
  0x49   :  { %147 = vrot.lane.b32.xlu1 %v1300_v8, %s1215_s14 }
  0x4a   :  { %187 = vrot.lane.b32.xlu0 %v1267_v0, %s1217_s15 }
  0x4d   :  { %185 = vrot.lane.b32.xlu1 %v1300_v8, %s1217_s15 }
  0x4e   :  { %166 = vrot.lane.b32.xlu0 %v1300_v8, %s1214_s13 }
  0x52   :  { %201 = vperm.xlu0 %1068, %v198_v12  }
  0x87   :  { %v1334_v14 = vpop.permute.xlu1 %989 }
  0x88   :  { %v1336_v15 = vpop.permute.xlu0 %979  ;;  %v991_v17 = vunpack.i.l.bf16 %v1334_v14  ;;  %v992_v11 = vunpack.i.h.bf16 %v1334_v14 }
  0x89   :  { %v982_v18 = vunpack.i.h.bf16 %v1336_v15  ;;  %v981_v19 = vunpack.i.l.bf16 %v1336_v15  ;;  %v1487_v15 = vld [vmem:[%s1871_s1] sm:$0xff] }
  0x8b   :  { %v1344_v20 = vpop.permute.xlu1 %994  ;;  %v63_v26 = vsel %vm58_vm0, %v981_v19, %v982_v18  ;;  %v64_v28 = vsel %vm58_vm0, %v991_v17, %v981_v19 }
  0x8c   :  { %v996_v21 = vunpack.i.l.bf16 %v1344_v20  ;;  %v1347_v22 = vpop.permute.xlu0 %984  ;;  %v997_v12 = vunpack.i.h.bf16 %v1344_v20 }
  0x8d   :  { %v987_v23 = vunpack.i.h.bf16 %v1347_v22  ;;  %v986_v24 = vunpack.i.l.bf16 %v1347_v22 }
  0x8f   :  { %v1355_v25 = vpop.permute.xlu1 %1004  ;;  %v82_v27 = vsel %vm77_vm1, %v986_v24, %v987_v23  ;;  %v83_v29 = vsel %vm77_vm1, %v996_v21, %v986_v24 }
  0x90   :  { %v1007_v30 = vunpack.i.h.bf16 %v1355_v25  ;;  %v1006_v31 = vunpack.i.l.bf16 %v1355_v25  ;;  %v1375_v32 = vpop.permute.xlu0 %999  ;;  %v870_v33 = vpack.c.bf16 %v82_v27, %v63_v26  ;;  %v872_v34 = vpack.c.bf16 %v83_v29, %v64_v28 }
  0x91   :  { %v1002_v35 = vunpack.i.h.bf16 %v1375_v32  ;;  %v1001_v36 = vunpack.i.l.bf16 %v1375_v32 }
  0x92   :  { %871 = vmatprep.subr.bf16.mxu0 %v870_v33  ;;  %v120_v37 = vsel %vm115_vm3, %v1006_v31, %v1007_v30  ;;  %v78_v33 = vsel %vm77_vm1, %v997_v12, %v996_v21 }
  0x93   :  { %873 = vmatpush1.bf16.msra.mxu0 %v872_v34  ;;  %v1383_v38 = vpop.permute.xlu1 %1014  ;;  %v101_v39 = vsel %vm96_vm2, %v1001_v36, %v1002_v35 }
  0x94   :  { %v1016_v40 = vunpack.i.l.bf16 %v1383_v38  ;;  %v1390_v41 = vpop.permute.xlu0 %1009  ;;  %v874_v42 = vpack.c.bf16 %v120_v37, %v101_v39  ;;  %v1017_v34 = vunpack.i.h.bf16 %v1383_v38 }
  0x95   :  { %v1011_v43 = vunpack.i.l.bf16 %v1390_v41 }
  0x96   :  { %875 = vmatprep.subr.bf16.mxu0 %v874_v42  ;;  %v121_v44 = vsel %vm115_vm3, %v1016_v40, %v1006_v31  ;;  %v59_v31 = vsel %vm58_vm0, %v992_v11, %v991_v17 }
  0x97   :  { %v1397_v45 = vpop.permute.xlu1 %122  ;;  %v102_v46 = vsel %vm96_vm2, %v1011_v43, %v1001_v36  ;;  %v1012_v36 = vunpack.i.h.bf16 %v1390_v41 }
  0x98   :  { %v1403_v47 = vpop.permute.xlu0 %1019  ;;  %v876_v48 = vpack.c.bf16 %v121_v44, %v102_v46 }
  0x99   :  { %v1022_v49 = vunpack.i.h.bf16 %v1403_v47  ;;  %v1021_v50 = vunpack.i.l.bf16 %v1403_v47 }
  0x9a   :  { %877 = vmatpush1.bf16.msra.mxu0 %v876_v48 }
  0x9b   :  { %v1408_v51 = vpop.permute.xlu1 %1029  ;;  %v138_v52 = vsel %vm134_vm4, %v1021_v50, %v1022_v49  ;;  %v139_v53 = vsel %vm134_vm4, %v1397_v45, %v1021_v50 }
  0x9c   :  { %v1032_v54 = vunpack.i.h.bf16 %v1408_v51  ;;  %v1031_v55 = vunpack.i.l.bf16 %v1408_v51  ;;  %v1421_v56 = vpop.permute.xlu0 %1024  ;;  %v878_v57 = vpack.c.bf16 %v138_v52, %v1275_v4  ;;  %v880_v58 = vpack.c.bf16 %v139_v53, %v1271_v2 }
  0x9d   :  { %v1027_v59 = vunpack.i.h.bf16 %v1421_v56  ;;  %v1026_v60 = vunpack.i.l.bf16 %v1421_v56  ;;  %v116_v53 = vsel %vm115_vm3, %v1017_v34, %v1016_v40 }
  0x9e   :  { %879 = vmatprep.subr.bf16.mxu0 %v878_v57  ;;  %v176_v61 = vsel %vm172_vm5, %v1031_v55, %v1032_v54 }
  0x9f   :  { %881 = vmatpush1.bf16.msra.mxu0 %v880_v58  ;;  %v1431_v62 = vpop.permute.xlu1 %160  ;;  %v157_v63 = vsel %vm153_vm6, %v1026_v60, %v1027_v59 }
  0xa0   :  { %v177_v2 = vsel %vm172_vm5, %v1431_v62, %v1031_v55  ;;  %v1440_v3 = vpop.permute.xlu0 %141  ;;  %v882_v4 = vpack.c.bf16 %v176_v61, %v157_v63 }
  0xa1   :  { %v158_v5 = vsel %vm153_vm6, %v1440_v3, %v1026_v60 }
  0xa2   :  { %v884_v7 = vpack.c.bf16 %v177_v2, %v158_v5  ;;  %883 = vmatprep.subr.bf16.mxu0 %v882_v4 }
  0xa3   :  { %v1446_v10 = vpop.permute.xlu1 %183 }
  0xa4   :  { %v182_v19 = vpop.permute.xlu0 %181  ;;  %885 = vmatpush1.bf16.msra.mxu0 %v884_v7 }
  0xa5   :  { %v195_v24 = vsel %vm191_vm7, %v182_v19, %v1446_v10 }
  0xa6   :  { %224 = vmatprep.subr.mxu0 %v195_v24 }
  0xa7   :  { %v1040_v26 = vpop.permute.xlu1 %1039 }
  0xa8   :  { %v1042_v27 = vunpack.i.h.bf16 %v1040_v26  ;;  %v1041_v28 = vunpack.i.l.bf16 %v1040_v26  ;;  %v1035_v29 = vpop.permute.xlu0 %1034 }
  0xa9   :  { %v1037_v37 = vunpack.i.h.bf16 %v1035_v29  ;;  %v1036_v39 = vunpack.i.l.bf16 %v1035_v29 }
  0xaa   :  { %v80_v42 = vsel %vm77_vm1, %v1042_v27, %v1041_v28  ;;  %v81_v14 = vsel %vm77_vm1, %v987_v23, %v1042_v27  ;;  %v79_v44 = vsel %vm77_vm1, %v1041_v28, %v997_v12  ;;  %v902_v23 = vpack.c.bf16 %v78_v33, %v59_v31 }
  0xab   :  { %v1045_v17 = vpop.permute.xlu1 %1044  ;;  %v61_v20 = vsel %vm58_vm0, %v1037_v37, %v1036_v39  ;;  %v62_v21 = vsel %vm58_vm0, %v982_v18, %v1037_v37  ;;  %v60_v46 = vsel %vm58_vm0, %v1036_v39, %v992_v11  ;;  %v97_v18 = vsel %vm96_vm2, %v1012_v36, %v1011_v43 }
  0xac   :  { %v1479_v22 = vpop.permute.xlu0 %179  ;;  %v886_v48 = vpack.c.bf16 %v80_v42, %v61_v20  ;;  %v888_v52 = vpack.c.bf16 %v81_v14, %v62_v21  ;;  %v1047_v55 = vunpack.i.h.bf16 %v1045_v17  ;;  %v1046_v57 = vunpack.i.l.bf16 %v1045_v17 }
  0xad   :  { %v196_v50 = vsel %vm191_vm7, %v1479_v22, %v182_v19  ;;  %v904_v58 = vpack.c.bf16 %v79_v44, %v60_v46  ;;  %v906_v41 = vpack.c.bf16 %v116_v53, %v97_v18 }
  0xae   :  { %225 = vmatpush1.msra.mxu0 %v196_v50  ;;  %887 = vmatprep.subr.bf16.mxu1 %v886_v48  ;;  %v99_v40 = vsel %vm96_vm2, %v1047_v55, %v1046_v57  ;;  %v98_v4 = vsel %vm96_vm2, %v1046_v57, %v1012_v36  ;;  %v100_v5 = vsel %vm96_vm2, %v1002_v35, %v1047_v55  ;;  %v42_v55 = vld [vmem:[%s1875_s5] sm:$0x3f] }
  0xaf   :  { %889 = vmatpush1.bf16.msra.mxu1 %v888_v52  ;;  %903 = vmatprep.subr.bf16.mxu0 %v902_v23  ;;  %v1055_v60 = vpop.permute.xlu1 %1054 }
  0xb0   :  { %v1057_v61 = vunpack.i.h.bf16 %v1055_v60  ;;  %v1056_v63 = vunpack.i.l.bf16 %v1055_v60  ;;  %v1050_v2 = vpop.permute.xlu0 %1049  ;;  %864 = vmatmul.mubr.msk.f32.vlgmr.msra.gmra.mrb[0].mxu0 %vm204_vm8, %v1487_v15 }
  0xb1   :  { %v1052_v43 = vunpack.i.h.bf16 %v1050_v2  ;;  %v1051_v38 = vunpack.i.l.bf16 %v1050_v2  ;;  %905 = vmatpush1.bf16.msra.mxu0 %v904_v58  ;;  %414 = vmatprep.mubr.f32.mxu0 %v1216_v9 }
  0xb2   :  { %907 = vmatprep.subr.bf16.mxu0 %v906_v41  ;;  %v140_v7 = vsel %vm134_vm4, %v1056_v63, %v1397_v45  ;;  %v135_v11 = vsel %vm134_vm4, %v1057_v61, %v1056_v63 }
  0xb3   :  { %v117_v12 = vsel %vm115_vm3, %v1051_v38, %v1017_v34  ;;  %v1065_v19 = vpop.permute.xlu1 %1064  ;;  %v118_v24 = vsel %vm115_vm3, %v1052_v43, %v1051_v38  ;;  %v119_v32 = vsel %vm115_vm3, %v1007_v30, %v1052_v43  ;;  %v910_v36 = vpack.c.bf16 %v140_v7, %v1269_v1 }
  0xb4   :  { %v908_v35 = vpack.c.bf16 %v117_v12, %v98_v4  ;;  %v1067_v26 = vunpack.i.h.bf16 %v1065_v19  ;;  %v1066_v27 = vunpack.i.l.bf16 %v1065_v19  ;;  %v1060_v28 = vpop.permute.xlu0 %1059  ;;  %v890_v45 = vpack.c.bf16 %v118_v24, %v99_v40 }
  0xb5   :  { %v1062_v29 = vunpack.i.h.bf16 %v1060_v28  ;;  %v1061_v31 = vunpack.i.l.bf16 %v1060_v28  ;;  %v892_v33 = vpack.c.bf16 %v119_v32, %v100_v5  ;;  %v912_v34 = vpack.c.bf16 %v135_v11, %v1267_v0 }
  0xb6   :  { %891 = vmatprep.subr.bf16.mxu1 %v890_v45  ;;  %909 = vmatpush1.bf16.msra.mxu0 %v908_v35  ;;  %v178_v25 = vsel %vm172_vm5, %v1066_v27, %v1431_v62  ;;  %v173_v1 = vsel %vm172_vm5, %v1067_v26, %v1066_v27 }
  0xb7   :  { %893 = vmatpush1.bf16.msra.mxu1 %v892_v33  ;;  %911 = vmatprep.subr.bf16.mxu0 %v910_v36  ;;  %v190_v30 = vpop.permute.xlu1 %189  ;;  %v159_v37 = vsel %vm153_vm6, %v1061_v31, %v1440_v3  ;;  %v154_v0 = vsel %vm153_vm6, %v1062_v29, %v1061_v31 }
  0xb8   :  { %v129_v39 = vpop.permute.xlu0 %128  ;;  %v914_v42 = vpack.c.bf16 %v178_v25, %v159_v37  ;;  %v916_v20 = vpack.c.bf16 %v173_v1, %v154_v0  ;;  %v197_v46 = vsel %vm191_vm7, %v190_v30, %v1479_v22 }
  0xb9   :  { %v136_v14 = vsel %vm134_vm4, %v129_v39, %v1057_v61  ;;  %v137_v62 = vsel %vm134_vm4, %v1022_v49, %v129_v39 }
  0xba   :  { %v894_v17 = vpack.c.bf16 %v136_v14, %v1300_v8  ;;  %v896_v3 = vpack.c.bf16 %v137_v62, %v1285_v6  ;;  %913 = vmatpush1.bf16.msra.mxu0 %v912_v34 }
  0xbb   :  { %915 = vmatprep.subr.bf16.mxu0 %v914_v42  ;;  %v148_v21 = vpop.permute.xlu1 %147 }
  0xbc   :  { %v188_v44 = vpop.permute.xlu0 %187  ;;  %895 = vmatprep.subr.bf16.mxu1 %v894_v17  ;;  %v155_v47 = vsel %vm153_vm6, %v148_v21, %v1062_v29  ;;  %v156_v6 = vsel %vm153_vm6, %v1027_v59, %v148_v21  ;;  %v609_v17 = vld [vmem:[%s1874_s4] sm:$0xff] }
  0xbd   :  { %897 = vmatpush1.bf16.msra.mxu1 %v896_v3  ;;  %v192_v48 = vsel %vm191_vm7, %v188_v44, %v190_v30 }
  0xbe   :  { %917 = vmatpush1.bf16.msra.mxu0 %v916_v20 }
  0xbf   :  { %366 = vmatprep.subr.mxu0 %v197_v46  ;;  %v186_v50 = vpop.permute.xlu1 %185 }
  0xc0   :  { %v167_v49 = vpop.permute.xlu0 %166  ;;  %v193_v56 = vsel %vm191_vm7, %v186_v50, %v188_v44  ;;  %v194_v51 = vsel %vm191_vm7, %v1446_v10, %v186_v50 }
  0xc1   :  { %v174_v23 = vsel %vm172_vm5, %v167_v49, %v1067_v26  ;;  %v175_v22 = vsel %vm172_vm5, %v1032_v54, %v167_v49  ;;  %v429_v54 = vshrl.u32 %v56_v13, 7 }
  0xc2   :  { %v898_v52 = vpack.c.bf16 %v174_v23, %v155_v47  ;;  %v900_v18 = vpack.c.bf16 %v175_v22, %v156_v6  ;;  %367 = vmatpush1.msra.mxu0 %v192_v48 }
  0xc3   :  { %866 = vmatmul.mubr.msk.f32.vlgmr.msra.gmra.mrb[2].mxu0 %vm204_vm8, %v1487_v15  ;;  %v430_v59 = vsub.s32 0, %v429_v54  ;;  %v434_v57 = vsub.s32 1, %v429_v54  ;;  %v438_v5 = vsub.s32 2, %v429_v54  ;;  %v450_v12 = vsub.s32 5, %v429_v54 }
  0xc4   :  { %899 = vmatprep.subr.bf16.mxu1 %v898_v52  ;;  %753 = vmatprep.mubr.f32.mxu0 %v1216_v9  ;;  %v442_v27 = vsub.s32 3, %v429_v54  ;;  %v446_v28 = vsub.s32 4, %v429_v54 }
  0xc5   :  { %901 = vmatpush1.bf16.msra.mxu1 %v900_v18  ;;  %v431_v61 = vrot.slane %v42_v55, %v430_v59  ;;  %v435_v2 = vrot.slane %v42_v55, %v434_v57  ;;  %v439_v24 = vrot.slane %v42_v55, %v438_v5  ;;  %v451_v31 = vrot.slane %v42_v55, %v450_v12 }
  0xc6   :  { %295 = vmatprep.subr.mxu1 %v193_v56  ;;  %v443_v34 = vrot.slane %v42_v55, %v442_v27  ;;  %v447_v37 = vrot.slane %v42_v55, %v446_v28 }
  0xc9   :  { %296 = vmatpush1.msra.mxu1 %v194_v51 }
  0xca   :  { %865 = vmatmul.mubr.msk.f32.vlgmr.msra.gmra.mrb[0].mxu1 %vm204_vm8, %v1487_v15 }
  0xcb   :  { %682 = vmatprep.mubr.f32.mxu1 %v1216_v9 }
  0xd1   :  { %v202_v53 = vpop.permute.xlu0 %201 }
 0x183   :  { %v274_v58 = vpop.f32.mrb[0].mxu0 }
 0x184   :  { %v275_v60 = vadd.f32 %v274_v58, %v202_v53  ;;  %v276_v63 = vpop.f32.mrb[1].mxu0 }
 0x185   :  { %v277_v10 = vadd.f32 %v276_v63, %v202_v53 }
 0x186   :  { %v421_v41 = vmax.f32 %v275_v60, 0.0 }
 0x187   :  { %v422_v43 = vmax.f32 %v277_v10, 0.0 }
 0x188   :  { %v1573_v15 = vmul.f32 %v431_v61, %v421_v41 }
 0x189   :  { %v1575_v38 = vmul.f32 %v435_v2, %v422_v43 }
 0x18a   :  { %537 = vrot.lane.b32.xlu1 %v1573_v15, %s1213_s12  ;;  %555 = vrot.lane.b32.xlu0 %v1573_v15, %s1215_s14 }
 0x18b   :  { %v1079_v13 = vpack.i.bf16 %v1575_v38, %v1573_v15 }
 0x18e   :  { %573 = vrot.lane.b32.xlu1 %v1573_v15, %s1214_s13  ;;  %1080 = vrot.lane.b32.xlu0 %v1079_v13, %s1212_s11 }
 0x192   :  { %1070 = vrot.lane.b32.xlu1 %v1079_v13, %s1209_s9 }
 0x196   :  { %v416_v40 = vpop.f32.mrb[2].mxu0  ;;  %1075 = vrot.lane.b32.xlu1 %v1079_v13, %s1210_s0 }
 0x197   :  { %v418_v4 = vpop.f32.mrb[3].mxu0  ;;  %v417_v45 = vadd.f32 %v416_v40, %v202_v53 }
 0x198   :  { %v419_v11 = vadd.f32 %v418_v4, %v202_v53 }
 0x199   :  { %v425_v30 = vmax.f32 %v417_v45, 0.0 }
 0x19a   :  { %1085 = vrot.lane.b32.xlu1 %v1079_v13, %s1211_s10  ;;  %v426_v29 = vmax.f32 %v419_v11, 0.0 }
 0x19b   :  { %v1601_v0 = vmul.f32 %v447_v37, %v425_v30 }
 0x19c   :  { %v1593_v39 = vmul.f32 %v451_v31, %v426_v29 }
 0x19d   :  { %v345_v7 = vpop.f32.mrb[0].mxu1 }
 0x19e   :  { %v346_v19 = vadd.f32 %v345_v7, %v202_v53  ;;  %v347_v32 = vpop.f32.mrb[1].mxu1 }
 0x19f   :  { %v348_v26 = vadd.f32 %v347_v32, %v202_v53 }
 0x1a0   :  { %v423_v35 = vmax.f32 %v346_v19, 0.0 }
 0x1a1   :  { %v424_v36 = vmax.f32 %v348_v26, 0.0 }
 0x1a2   :  { %v1589_v33 = vmul.f32 %v439_v24, %v423_v35 }
 0x1a3   :  { %v1597_v42 = vmul.f32 %v443_v34, %v424_v36 }
 0x1a4   :  { %v1089_v25 = vpack.i.bf16 %v1589_v33, %v1575_v38  ;;  %v1114_v1 = vpack.i.bf16 %v1589_v33, %v1593_v39 }
 0x1a5   :  { %v1104_v14 = vpack.i.bf16 %v1601_v0, %v1597_v42  ;;  %v1134_v62 = vpack.i.bf16 %v1597_v42, %v1589_v33 }
 0x1a6   :  { %1090 = vrot.lane.b32.xlu0 %v1089_v25, %s1213_s12  ;;  %1100 = vrot.lane.b32.xlu1 %v1089_v25, %s1214_s13 }
 0x1aa   :  { %1095 = vrot.lane.b32.xlu0 %v1089_v25, %s1215_s14  ;;  %1115 = vrot.lane.b32.xlu1 %v1114_v1, %s1210_s0 }
 0x1ae   :  { %1105 = vrot.lane.b32.xlu0 %v1104_v14, %s1209_s9  ;;  %529 = vrot.lane.b32.xlu1 %v1593_v39, %s1211_s10 }
 0x1b2   :  { %1110 = vrot.lane.b32.xlu0 %v1114_v1, %s1209_s9  ;;  %1125 = vrot.lane.b32.xlu1 %v1104_v14, %s1210_s0 }
 0x1b6   :  { %1120 = vrot.lane.b32.xlu0 %v1114_v1, %s1212_s11  ;;  %595 = vrot.lane.b32.xlu1 %v1589_v33, %s1217_s15 }
 0x1ba   :  { %593 = vrot.lane.b32.xlu0 %v1575_v38, %s1217_s15  ;;  %1130 = vrot.lane.b32.xlu1 %v1104_v14, %s1212_s11 }
 0x1be   :  { %591 = vrot.lane.b32.xlu0 %v1573_v15, %s1217_s15  ;;  %527 = vrot.lane.b32.xlu1 %v1601_v0, %s1211_s10 }
 0x1c2   :  { %1135 = vrot.lane.b32.xlu0 %v1134_v62, %s1211_s10  ;;  %547 = vrot.lane.b32.xlu1 %v1593_v39, %s1213_s12 }
 0x1c6   :  { %1140 = vrot.lane.b32.xlu0 %v1104_v14, %s1213_s12  ;;  %565 = vrot.lane.b32.xlu1 %v1593_v39, %s1215_s14 }
 0x1ca   :  { %1145 = vrot.lane.b32.xlu0 %v1104_v14, %s1215_s14  ;;  %583 = vrot.lane.b32.xlu1 %v1593_v39, %s1214_s13 }
 0x1ce   :  { %1150 = vrot.lane.b32.xlu0 %v1104_v14, %s1214_s13  ;;  %599 = vrot.lane.b32.xlu1 %v1601_v0, %s1217_s15 }
 0x1d2   :  { %597 = vrot.lane.b32.xlu0 %v1597_v42, %s1217_s15  ;;  %612 = vperm.xlu1 %1154, %v609_v17  }
 0x1d6   :  { %601 = vrot.lane.b32.xlu0 %v1593_v39, %s1217_s15 }
 0x1fc   :  { %v1643_v3 = vpop.permute.xlu1 %537  ;;  %v1651_v50 = vpop.permute.xlu0 %555 }
 0x200   :  { %v1645_v20 = vpop.permute.xlu1 %573  ;;  %v1653_v52 = vpop.permute.xlu0 %1080 }
 0x201   :  { %v1083_v53 = vunpack.i.h.bf16 %v1653_v52  ;;  %v1082_v55 = vunpack.i.l.bf16 %v1653_v52 }
 0x203   :  { %v517_v43 = vsel %vm96_vm2, %v1082_v55, %v1083_v53 }
 0x204   :  { %v1071_v21 = vpop.permute.xlu1 %1070 }
 0x205   :  { %v1073_v44 = vunpack.i.h.bf16 %v1071_v21  ;;  %v1072_v46 = vunpack.i.l.bf16 %v1071_v21 }
 0x207   :  { %v481_v48 = vsel %vm58_vm0, %v1072_v46, %v1073_v44 }
 0x208   :  { %v1076_v47 = vpop.permute.xlu1 %1075 }
 0x209   :  { %v1078_v49 = vunpack.i.h.bf16 %v1076_v47  ;;  %v1077_v6 = vunpack.i.l.bf16 %v1076_v47 }
 0x20b   :  { %v499_v23 = vsel %vm77_vm1, %v1077_v6, %v1078_v49 }
 0x20c   :  { %v918_v22 = vpack.c.bf16 %v499_v23, %v481_v48  ;;  %v1655_v18 = vpop.permute.xlu1 %1085 }
 0x20d   :  { %v1088_v60 = vunpack.i.h.bf16 %v1655_v18  ;;  %v1087_v61 = vunpack.i.l.bf16 %v1655_v18  ;;  %v1786_v18 = vld [vmem:[%s1872_s2] sm:$0xff]  ;;  %s1219_s2 = smov [#allocation5]  }
 0x20e   :  { %919 = vmatprep.subr.bf16.mxu1 %v918_v22  ;;  %s855_s22 = sshll.u32 %s1219_s2, 4  ;;  %s856_s22 = int_to_ptr.vmem [resolvable:$true] %s855_s22 }
 0x20f   :  { %v535_v19 = vsel %vm115_vm3, %v1087_v61, %v1088_v60  ;;  %s1182_s23 = scalar_lea.vmem %s856_s22, 768  ;;  %p1187_p9 = scmp.lt.s32.totalorder %s856_s22, %s856_s22 }
 0x210   :  { %v922_v25 = vpack.c.bf16 %v535_v19, %v517_v43  ;;  %p1183_p8 = scmp.ne.s32.totalorder %s856_s22, %s1182_s23  ;;  %p1188_p10 = scmp.lt.s32.totalorder %s1182_s23, %s1182_s23 }
 0x212   :  { %p1189_p11 = por %p1188_p10, %p1187_p9 }
 0x214   :  { %p1190_p12 = pnand %p1189_p11, %p1183_p8 }
 0x218   :  { %v1657_v56 = vpop.permute.xlu0 %1090  ;;  %v1659_v51 = vpop.permute.xlu1 %1100 }
 0x219   :  { %v1093_v7 = vunpack.i.h.bf16 %v1657_v56  ;;  %v1092_v11 = vunpack.i.l.bf16 %v1657_v56  ;;  %v1103_v17 = vunpack.i.h.bf16 %v1659_v51  ;;  %v1102_v21 = vunpack.i.l.bf16 %v1659_v51 }
 0x21b   :  { %v552_v1 = vsel %vm134_vm4, %v1092_v11, %v1093_v7 }
 0x21c   :  { %v1661_v54 = vpop.permute.xlu0 %1095  ;;  %v1663_v59 = vpop.permute.xlu1 %1115 }
 0x21d   :  { %v1118_v63 = vunpack.i.h.bf16 %v1663_v59  ;;  %v1117_v10 = vunpack.i.l.bf16 %v1663_v59  ;;  %v1098_v30 = vunpack.i.h.bf16 %v1661_v54  ;;  %v1097_v37 = vunpack.i.l.bf16 %v1661_v54 }
 0x21f   :  { %v498_v12 = vsel %vm77_vm1, %v1078_v49, %v1118_v63  ;;  %v500_v24 = vsel %vm77_vm1, %v1117_v10, %v1077_v6  ;;  %v553_v49 = vsel %vm134_vm4, %v1643_v3, %v1092_v11  ;;  %v926_v6 = vpack.c.bf16 %v552_v1, %v1575_v38 }
 0x220   :  { %v1667_v57 = vpop.permute.xlu0 %1105  ;;  %v1669_v58 = vpop.permute.xlu1 %529  ;;  %v570_v48 = vsel %vm153_vm6, %v1097_v37, %v1098_v30  ;;  %v928_v23 = vpack.c.bf16 %v553_v49, %v1573_v15  ;;  %v571_v38 = vsel %vm153_vm6, %v1651_v50, %v1097_v37  ;;  %v589_v15 = vsel %vm172_vm5, %v1645_v20, %v1102_v21 }
 0x221   :  { %v1107_v13 = vunpack.i.l.bf16 %v1667_v57  ;;  %v536_v14 = vsel %vm115_vm3, %v1669_v58, %v1087_v61  ;;  %v588_v61 = vsel %vm172_vm5, %v1102_v21, %v1103_v17  ;;  %v932_v11 = vpack.c.bf16 %v589_v15, %v571_v38 }
 0x224   :  { %v1675_v2 = vpop.permute.xlu0 %1110  ;;  %v1677_v41 = vpop.permute.xlu1 %1125 }
 0x225   :  { %v1113_v40 = vunpack.i.h.bf16 %v1675_v2  ;;  %v1112_v4 = vunpack.i.l.bf16 %v1675_v2  ;;  %v1127_v5 = vunpack.i.l.bf16 %v1677_v41  ;;  %v930_v2 = vpack.c.bf16 %v588_v61, %v570_v48 }
 0x227   :  { %v480_v32 = vsel %vm58_vm0, %v1073_v44, %v1113_v40  ;;  %v482_v35 = vsel %vm58_vm0, %v1112_v4, %v1072_v46  ;;  %v479_v26 = vsel %vm58_vm0, %v1113_v40, %v1107_v13  ;;  %v497_v31 = vsel %vm77_vm1, %v1118_v63, %v1127_v5 }
 0x228   :  { %v920_v27 = vpack.c.bf16 %v500_v24, %v482_v35  ;;  %v936_v28 = vpack.c.bf16 %v498_v12, %v480_v32  ;;  %v1707_v45 = vpop.permute.xlu0 %1120  ;;  %v1709_v29 = vpop.permute.xlu1 %595  ;;  %v934_v34 = vpack.c.bf16 %v497_v31, %v479_v26  ;;  %v1128_v63 = vunpack.i.h.bf16 %v1677_v41 }
 0x229   :  { %v1122_v36 = vunpack.i.l.bf16 %v1707_v45  ;;  %v1123_v43 = vunpack.i.h.bf16 %v1707_v45  ;;  %v1108_v12 = vunpack.i.h.bf16 %v1667_v57 }
 0x22a   :  { %921 = vmatpush1.bf16.msra.mxu1 %v920_v27  ;;  %935 = vmatprep.subr.bf16.mxu0 %v934_v34  ;;  %v496_v32 = vsel %vm77_vm1, %v1127_v5, %v1128_v63  ;;  %v495_v31 = vsel %vm77_vm1, %v1128_v63, %v1117_v10 }
 0x22b   :  { %v518_v62 = vsel %vm96_vm2, %v1122_v36, %v1082_v55  ;;  %923 = vmatprep.subr.bf16.mxu1 %v922_v25  ;;  %937 = vmatpush1.bf16.msra.mxu0 %v936_v28  ;;  %v477_v28 = vsel %vm58_vm0, %v1108_v12, %v1112_v4  ;;  %v516_v5 = vsel %vm96_vm2, %v1083_v53, %v1123_v43 }
 0x22c   :  { %v924_v44 = vpack.c.bf16 %v536_v14, %v518_v62  ;;  %v594_v46 = vpop.permute.xlu0 %593  ;;  %v1729_v47 = vpop.permute.xlu1 %1130 }
 0x22d   :  { %v1132_v40 = vunpack.i.l.bf16 %v1729_v47  ;;  %v1133_v26 = vunpack.i.h.bf16 %v1729_v47  ;;  %v606_v27 = vsel %vm191_vm7, %v594_v46, %v1709_v29 }
 0x22e   :  { %925 = vmatpush1.bf16.msra.mxu1 %v924_v44  ;;  %v950_v44 = vpack.c.bf16 %v495_v31, %v477_v28  ;;  %v1155_v31 = vld [vmem:[#allocation2] sm:$0xff] }
 0x22f   :  { %927 = vmatprep.subr.bf16.mxu1 %v926_v6  ;;  %v515_v25 = vsel %vm96_vm2, %v1123_v43, %v1132_v40  ;;  %v513_v21 = vsel %vm96_vm2, %v1133_v26, %v1122_v36 }
 0x230   :  { %v1740_v22 = vpop.permute.xlu0 %591  ;;  %v528_v55 = vpop.permute.xlu1 %527 }
 0x231   :  { %v531_v10 = vsel %vm115_vm3, %v528_v55, %v1669_v58  ;;  %v607_v1 = vsel %vm191_vm7, %v1740_v22, %v594_v46 }
 0x232   :  { %929 = vmatpush1.bf16.msra.mxu1 %v928_v23  ;;  %v954_v47 = vpack.c.bf16 %v531_v10, %v513_v21  ;;  %v1158_v21 = vld [vmem:[#allocation2 + $0x20] sm:$0xff] }
 0x233   :  { %931 = vmatprep.subr.bf16.mxu1 %v930_v2 }
 0x234   :  { %v1136_v19 = vpop.permute.xlu0 %1135  ;;  %v548_v24 = vpop.permute.xlu1 %547 }
 0x235   :  { %v1138_v41 = vunpack.i.h.bf16 %v1136_v19  ;;  %v1137_v35 = vunpack.i.l.bf16 %v1136_v19  ;;  %v554_v56 = vsel %vm134_vm4, %v548_v24, %v1643_v3 }
 0x236   :  { %933 = vmatpush1.bf16.msra.mxu1 %v932_v11 }
 0x237   :  { %v534_v34 = vsel %vm115_vm3, %v1088_v60, %v1137_v35  ;;  %634 = vmatprep.subr.mxu1 %v606_v27  ;;  %v533_v59 = vsel %vm115_vm3, %v1137_v35, %v1138_v41  ;;  %v478_v60 = vsel %vm58_vm0, %v1107_v13, %v1108_v12  ;;  %v532_v45 = vsel %vm115_vm3, %v1138_v41, %v528_v55 }
 0x238   :  { %v940_v52 = vpack.c.bf16 %v534_v34, %v516_v5  ;;  %v1141_v4 = vpop.permute.xlu0 %1140  ;;  %v566_v37 = vpop.permute.xlu1 %565  ;;  %v938_v53 = vpack.c.bf16 %v533_v59, %v515_v25  ;;  %v952_v62 = vpack.c.bf16 %v496_v32, %v478_v60 }
 0x239   :  { %v1143_v14 = vunpack.i.h.bf16 %v1141_v4  ;;  %v1142_v58 = vunpack.i.l.bf16 %v1141_v4  ;;  %v572_v2 = vsel %vm153_vm6, %v566_v37, %v1651_v50 }
 0x23a   :  { %635 = vmatpush1.msra.mxu1 %v607_v1  ;;  %939 = vmatprep.subr.bf16.mxu0 %v938_v53  ;;  %v1157_v53 = vld [vmem:[#allocation2 + $0x10] sm:$0xff] }
 0x23b   :  { %v551_v57 = vsel %vm134_vm4, %v1093_v7, %v1142_v58  ;;  %867 = vmatmul.mubr.msk.f32.vlgmr.msra.gmra.mrb[2].mxu1 %vm204_vm8, %v1786_v18  ;;  %941 = vmatpush1.bf16.msra.mxu0 %v940_v52  ;;  %v550_v13 = vsel %vm134_vm4, %v1142_v58, %v1143_v14  ;;  %v514_v7 = vsel %vm96_vm2, %v1132_v40, %v1133_v26 }
 0x23c   :  { %v944_v36 = vpack.c.bf16 %v551_v57, %v1589_v33  ;;  %951 = vmatprep.subr.bf16.mxu1 %v950_v44  ;;  %v1146_v46 = vpop.permute.xlu0 %1145  ;;  %v942_v49 = vpack.c.bf16 %v550_v13, %v1597_v42  ;;  %824 = vmatprep.mubr.f32.mxu1 %v1216_v9  ;;  %v584_v6 = vpop.permute.xlu1 %583  ;;  %v956_v48 = vpack.c.bf16 %v532_v45, %v514_v7  ;;  %v1159_v57 = vld [vmem:[#allocation2 + $0x28] sm:$0xff] }
 0x23d   :  { %953 = vmatpush1.bf16.msra.mxu1 %v952_v62  ;;  %v549_v33 = vsel %vm134_vm4, %v1143_v14, %v548_v24  ;;  %v1148_v23 = vunpack.i.h.bf16 %v1146_v46  ;;  %v1147_v55 = vunpack.i.l.bf16 %v1146_v46  ;;  %v958_v9 = vpack.c.bf16 %v554_v56, %v1593_v39 }
 0x23e   :  { %955 = vmatprep.subr.bf16.mxu1 %v954_v47  ;;  %943 = vmatprep.subr.bf16.mxu0 %v942_v49  ;;  %v590_v3 = vsel %vm172_vm5, %v584_v6, %v1645_v20  ;;  %v960_v63 = vpack.c.bf16 %v549_v33, %v1601_v0 }
 0x23f   :  { %945 = vmatpush1.bf16.msra.mxu0 %v944_v36  ;;  %v569_v39 = vsel %vm153_vm6, %v1098_v30, %v1147_v55  ;;  %v568_v15 = vsel %vm153_vm6, %v1147_v55, %v1148_v23  ;;  %v962_v43 = vpack.c.bf16 %v590_v3, %v572_v2  ;;  %v567_v51 = vsel %vm153_vm6, %v1148_v23, %v566_v37 }
 0x240   :  { %v1151_v42 = vpop.permute.xlu0 %1150  ;;  %v600_v30 = vpop.permute.xlu1 %599 }
 0x241   :  { %v1153_v61 = vunpack.i.h.bf16 %v1151_v42  ;;  %v1152_v38 = vunpack.i.l.bf16 %v1151_v42  ;;  %957 = vmatpush1.bf16.msra.mxu1 %v956_v48 }
 0x242   :  { %959 = vmatprep.subr.bf16.mxu1 %v958_v9 }
 0x243   :  { %v587_v20 = vsel %vm172_vm5, %v1103_v17, %v1152_v38  ;;  %v586_v0 = vsel %vm172_vm5, %v1152_v38, %v1153_v61  ;;  %v585_v50 = vsel %vm172_vm5, %v1153_v61, %v584_v6 }
 0x244   :  { %v948_v40 = vpack.c.bf16 %v587_v20, %v569_v39  ;;  %v598_v54 = vpop.permute.xlu0 %597  ;;  %v946_v11 = vpack.c.bf16 %v586_v0, %v568_v15  ;;  %v964_v17 = vpack.c.bf16 %v585_v50, %v567_v51 }
 0x245   :  { %961 = vmatpush1.bf16.msra.mxu1 %v960_v63  ;;  %v604_v12 = vsel %vm191_vm7, %v598_v54, %v600_v30  ;;  %v605_v32 = vsel %vm191_vm7, %v1709_v29, %v598_v54  ;;  %v1156_v29 = vld [vmem:[#allocation2 + $0x8] sm:$0xff] }
 0x246   :  { %963 = vmatprep.subr.bf16.mxu1 %v962_v43  ;;  %947 = vmatprep.subr.bf16.mxu0 %v946_v11 }
 0x247   :  { %949 = vmatpush1.bf16.msra.mxu0 %v948_v40 }
 0x248   :  { %v602_v19 = vpop.permute.xlu0 %601  ;;  %705 = vmatprep.subr.mxu0 %v604_v12 }
 0x249   :  { %965 = vmatpush1.bf16.msra.mxu1 %v964_v17  ;;  %v608_v24 = vsel %vm191_vm7, %v602_v19, %v1740_v22  ;;  %v603_v41 = vsel %vm191_vm7, %v600_v30, %v602_v19 }
 0x24a   :  { %776 = vmatprep.subr.mxu1 %v608_v24 }
 0x24b   :  { %706 = vmatpush1.msra.mxu0 %v605_v32 }
 0x24c   :  { %868 = vmatmul.mubr.msk.f32.vlgmr.msra.gmra.mrb[4].mxu0 %vm204_vm8, %v1786_v18 }
 0x24d   :  { %777 = vmatpush1.msra.mxu1 %v603_v41 }
 0x24e   :  { %869 = vmatmul.mubr.msk.f32.vlgmr.msra.gmra.mrb[4].mxu1 %vm204_vm8, %v1786_v18 }
 0x251   :  { %v613_v35 = vpop.permute.xlu1 %612 }
 0x30e   :  { %v684_v26 = vpop.f32.mrb[2].mxu1 }
 0x30f   :  { %v685_v27 = vadd.f32 %v684_v26, %v613_v35  ;;  %v686_v22 = vpop.f32.mrb[3].mxu1 }
 0x310   :  { %v687_v28 = vadd.f32 %v686_v22, %v613_v35 }
 0x311   :  { %v831_v5 = vadd.f32 %v1155_v31, %v685_v27 }
 0x312   :  { %v832_v34 = vadd.f32 %v1156_v29, %v687_v28 }
 0x313   :  { %v837_v25 = vmax.f32 %v831_v5, 0.0 }
 0x314   :  { %v838_v59 = vmax.f32 %v832_v34, 0.0 }
 0x315   :  { %843 = vst [vmem:[#allocation5] sm:$0xff] %v837_v25 }
 0x316   :  { %844 = vst [vmem:[#allocation5 + $0x8] sm:$0xff] %v838_v59 }
 0x31f   :  { %v755_v16 = vpop.f32.mrb[4].mxu0 }
 0x320   :  { %v756_v10 = vadd.f32 %v755_v16, %v613_v35  ;;  %v757_v52 = vpop.f32.mrb[5].mxu0 }
 0x321   :  { %v758_v4 = vadd.f32 %v757_v52, %v613_v35  ;;  %v826_v37 = vpop.f32.mrb[4].mxu1 }
 0x322   :  { %v833_v18 = vadd.f32 %v1157_v53, %v756_v10  ;;  %v827_v60 = vadd.f32 %v826_v37, %v613_v35  ;;  %v828_v1 = vpop.f32.mrb[5].mxu1 }
 0x323   :  { %v834_v14 = vadd.f32 %v758_v4, %v1300_v8  ;;  %v829_v58 = vadd.f32 %v828_v1, %v613_v35 }
 0x324   :  { %v839_v62 = vmax.f32 %v833_v18, 0.0  ;;  %v835_v44 = vadd.f32 %v1158_v21, %v827_v60 }
 0x325   :  { %v840_v47 = vmax.f32 %v834_v14, 0.0  ;;  %v836_v13 = vadd.f32 %v1159_v57, %v829_v58 }
 0x326   :  { %845 = vst [vmem:[#allocation5 + $0x10] sm:$0xff] %v839_v62  ;;  %v841_v45 = vmax.f32 %v835_v44, 0.0 }
 0x327   :  { %846 = vst [vmem:[#allocation5 + $0x18] sm:$0xff] %v840_v47  ;;  %v842_v36 = vmax.f32 %v836_v13, 0.0 }
 0x328   :  { %847 = vst [vmem:[#allocation5 + $0x20] sm:$0xff] %v841_v45 }
 0x329   :  { %848 = vst [vmem:[#allocation5 + $0x28] sm:$0xff] %v842_v36 }
 0x32a   :  { %1193 = shalt.err (!%p1190_p12)
}
 0x32b   :  { %s1194_s26 = scalar_lea.hbm %s1876_s6, 768 }
 0x32c   :  { %p1195_p13 = scmp.ne.s32.totalorder %s1876_s6, %s1194_s26  ;;  %p1198_p0 = scmp.lt.u32.totalorder %s1194_s26, %s1876_s6 }
 0x32e   :  { %p1200_p1 = pnand %p1198_p0, %p1195_p13 }
 0x330   :  { %1203 = shalt.err (!%p1200_p1)
}
 0x331   :  { %858 = dma.vmem_to_hbm [thread:$0]  %s856_s22, 768, %s1876_s6, [#allocation4]  }
 0x332   :  { %1206 = dma.done.wait [#allocation4], 768  }
 0x333   :  { %1207 = vsyncadd [#allocation4], 4294966528 }
 0x334   :  { %862 = vsyncpa [#allocation3], 1 }
 0x335   :  { %863 = vsyncpa [#allocation4], 1 }

</bundles_post_ra>
